<compile_context>
chip_gen: v6e
topology: v6e:2x2x1
jax: 0.10.0
libtpu: 0.0.40
codegen_flags: <defaults>
</compile_context>

<pallas_src>
import functools
import math

import jax
import jax.numpy as jnp
from jax.experimental import pallas as pl
from jax.experimental.pallas import tpu as pltpu


def _rup(x, m):
    return (x + m - 1) // m * m


# --------------------------------------------------------------------------
# Kernels
# --------------------------------------------------------------------------
def _linear_ws_kernel(x_ref, w_ref, b_ref, o_ref):
    """Weight-stationary: o = x @ W + b in one shot (full K, full N per block).

    x arrives in its producer dtype (f32) and is cast to bf16 on the VPU; the
    MXU accumulates in f32 via preferred_element_type.  W/b block indices are
    grid-invariant, so they are fetched once and stay resident in VMEM.
    """
    x = x_ref[...].astype(jnp.bfloat16)
    o_ref[...] = (
        jnp.dot(x, w_ref[...], preferred_element_type=jnp.float32) + b_ref[...]
    )


def _linear_tiled_kernel(x_ref, w_ref, b_ref, o_ref):
    """General tiled path: accumulate over the K grid axis into the f32 output
    block (k-invariant output index => VMEM-resident accumulator).  Bias is
    folded into the k==0 init, so there is no separate epilogue pass."""
    @pl.when(pl.program_id(2) == 0)
    def _():
        o_ref[...] = jnp.broadcast_to(b_ref[...], o_ref.shape)

    o_ref[...] += jnp.dot(
        x_ref[...].astype(jnp.bfloat16), w_ref[...],
        preferred_element_type=jnp.float32)


# --------------------------------------------------------------------------
# Parameters (nn.Linear-style init, pre-transformed once for the kernel)
# --------------------------------------------------------------------------
def make_time_distributed_linear_params(key, in_features, out_features):
    kw, kb = jax.random.split(key)
    bound = 1.0 / math.sqrt(in_features)
    w = jax.random.uniform(kw, (out_features, in_features), jnp.float32,
                           -bound, bound)
    b = jax.random.uniform(kb, (out_features,), jnp.float32, -bound, bound)

    # Pre-transform once: (out, in) -> (K, Np); pad N only to the 128-lane
    # boundary (hardware alignment), keep K unpadded, cast W to bf16.
    n_pad = _rup(out_features, 128)
    w_kn = jnp.pad(w.T, ((0, 0), (0, n_pad - out_features))).astype(jnp.bfloat16)
    b_1n = jnp.pad(b, (0, n_pad - out_features)).reshape(1, n_pad)  # f32
    return {"w_kn": w_kn, "b_1n": b_1n, "w_f32": w, "b_f32": b}


# --------------------------------------------------------------------------
# Pallas-backed Linear
# --------------------------------------------------------------------------
_VMEM_LIMIT = 48 * 1024 * 1024          # safe on v5e/v6e (128 MiB) and v7x (64 MiB)
_WS_WEIGHT_BUDGET = 4 * 1024 * 1024     # weight-stationary if bf16 W fits in this


def _pick_tm(M, K):
    """M tile: as big as ~16 MiB of double-buffered x allows, capped at 512."""
    cap = (16 * 1024 * 1024) // (max(K, 1) * 4 * 2)
    cap = max(8, min(512, (cap // 8) * 8))
    if M <= cap:
        return M, M, False          # full-extent block, no padding, no slicing
    m_pad = _rup(M, 8)
    return cap, m_pad, m_pad != M


def _linear_weight_stationary(x2d, w_kn, b_1n, n_out):
    M, K = x2d.shape
    _, Np = w_kn.shape
    tm, Mp, pad_m = _pick_tm(M, K)
    xp = jnp.pad(x2d, ((0, Mp - M), (0, 0))) if pad_m else x2d

    out = pl.pallas_call(
        _linear_ws_kernel,
        out_shape=jax.ShapeDtypeStruct((Mp, Np), jnp.float32),
        grid_spec=pltpu.PrefetchScalarGridSpec(
            num_scalar_prefetch=0,
            grid=(pl.cdiv(Mp, tm),),
            in_specs=[
                pl.BlockSpec((tm, K), lambda i: (i, 0)),     # x: stream over M
                pl.BlockSpec((K, Np), lambda i: (0, 0)),      # W: resident
                pl.BlockSpec((1, Np), lambda i: (0, 0)),      # b: resident
            ],
            out_specs=pl.BlockSpec((tm, Np), lambda i: (i, 0)),
        ),
        compiler_params=pltpu.CompilerParams(
            dimension_semantics=("parallel",),
            vmem_limit_bytes=_VMEM_LIMIT),
    )(xp, w_kn, b_1n)

    if Mp != M or Np != n_out:
        out = out[:M, :n_out]
    return out


def _linear_tiled(x2d, w_kn, b_1n, n_out):
    M, K = x2d.shape
    _, Np = w_kn.shape

    Kp = _rup(K, 128)
    tk = next(t for t in (512, 256, 128) if Kp % t == 0)
    tn = 256 if Np % 256 == 0 else 128
    M8 = _rup(M, 8)
    tm = min(M8, 256)

    xp = (jnp.pad(x2d, ((0, M8 - M), (0, Kp - K)))
          if (M8 != M or Kp != K) else x2d)
    wp = jnp.pad(w_kn, ((0, Kp - K), (0, 0))) if Kp != K else w_kn

    out = pl.pallas_call(
        _linear_tiled_kernel,
        out_shape=jax.ShapeDtypeStruct((M8, Np), jnp.float32),
        grid_spec=pltpu.PrefetchScalarGridSpec(
            num_scalar_prefetch=0,
            grid=(pl.cdiv(M8, tm), Np // tn, Kp // tk),
            in_specs=[
                pl.BlockSpec((tm, tk), lambda i, j, k: (i, k)),
                pl.BlockSpec((tk, tn), lambda i, j, k: (k, j)),
                pl.BlockSpec((1, tn), lambda i, j, k: (0, j)),
            ],
            out_specs=pl.BlockSpec((tm, tn), lambda i, j, k: (i, j)),
        ),
        compiler_params=pltpu.CompilerParams(
            dimension_semantics=("parallel", "parallel", "arbitrary"),
            vmem_limit_bytes=_VMEM_LIMIT),
    )(xp, wp, b_1n)

    if M8 != M or Np != n_out:
        out = out[:M, :n_out]
    return out


def linear_pallas(x2d, w_kn, b_1n, out_features):
    K = x2d.shape[1]
    Kw, Np = w_kn.shape
    assert K == Kw, (K, Kw)
    weight_bytes = Kw * Np * 2 + Np * 4
    if weight_bytes <= _WS_WEIGHT_BUDGET:
        return _linear_weight_stationary(x2d, w_kn, b_1n, out_features)
    return _linear_tiled(x2d, w_kn, b_1n, out_features)


# --------------------------------------------------------------------------
# TimeDistributed wrapper (mirrors TimeDistributed.forward, module == Linear)
# --------------------------------------------------------------------------
def time_distributed_forward(x, w_kn, b_1n, out_features, batch_first=True):
    if x.ndim <= 2:
        return linear_pallas(x, w_kn, b_1n, out_features)
    x_reshape = x.reshape(-1, x.shape[-1])                  # (B*T, F)
    y = linear_pallas(x_reshape, w_kn, b_1n, out_features)  # (B*T, F_out)
    if batch_first:
        return y.reshape(x.shape[0], -1, y.shape[-1])
    return y.reshape(-1, x.shape[1], y.shape[-1])


if __name__ == "__main__":
    key = jax.random.PRNGKey(0)
    kp, kx, kx2 = jax.random.split(key, 3)

    B, T, F_IN, F_OUT = 2, 8, 32, 64
    params = make_time_distributed_linear_params(kp, F_IN, F_OUT)
    x = jax.random.normal(kx, (B, T, F_IN), jnp.float32)

    fwd = jax.jit(time_distributed_forward,
                  static_argnames=("out_features", "batch_first"))
    out = jax.block_until_ready(
        fwd(x, params["w_kn"], params["b_1n"],
            out_features=F_OUT, batch_first=True))
    assert out.shape == (B, T, F_OUT), out.shape
    assert out.dtype == jnp.float32

    # Pure-JAX reference (f32).  bf16 MXU operands -> small error at K=32.
    ref = (x.reshape(-1, F_IN) @ params["w_f32"].T + params["b_f32"]
           ).reshape(B, T, F_OUT)
    assert jnp.allclose(out, ref, rtol=2e-2, atol=2e-2), \
        float(jnp.max(jnp.abs(out - ref)))

    # 2-D branch of TimeDistributed.forward (len(x.size()) <= 2).
    x2 = jax.random.normal(kx2, (4, F_IN), jnp.float32)
    out2 = jax.block_until_ready(
        time_distributed_forward(x2, params["w_kn"], params["b_1n"], F_OUT))
    assert out2.shape == (4, F_OUT), out2.shape
    ref2 = x2 @ params["w_f32"].T + params["b_f32"]
    assert jnp.allclose(out2, ref2, rtol=2e-2, atol=2e-2)

    # batch_first=False branch.
    out3 = jax.block_until_ready(
        fwd(x, params["w_kn"], params["b_1n"],
            out_features=F_OUT, batch_first=False))
    assert out3.shape == (B, T, F_OUT)
    assert jnp.allclose(out3, ref, rtol=2e-2, atol=2e-2)

    print("KERNEL_OK")
</pallas_src>

<mosaic_0001>
module attributes {stable_mosaic.version = 11 : i64} {
  func.func @_linear_ws_kernel(%arg0: i32, %arg1: memref<16x32xf32, #tpu.memory_space<vmem>>, %arg2: memref<32x128xbf16, #tpu.memory_space<vmem>>, %arg3: memref<1x128xf32, #tpu.memory_space<vmem>>, %arg4: memref<16x128xf32, #tpu.memory_space<vmem>>) attributes {dimension_semantics = [#tpu.dimension_semantics<parallel>], iteration_bounds = array<i64: 1>, scalar_prefetch = 0 : i64, scratch_operands = 0 : i64, tpu.core_type = #tpu.core_type<tc>, window_params = [{transform_indices = @transform_0, window_bounds = array<i64: 16, 32>}, {pipeline_mode = #tpu.pipeline_mode<synchronous>, transform_indices = @transform_1, window_bounds = array<i64: 32, 128>}, {pipeline_mode = #tpu.pipeline_mode<synchronous>, transform_indices = @transform_2, window_bounds = array<i64: 1, 128>}, {transform_indices = @transform_3, window_bounds = array<i64: 16, 128>}]} {
    %c0 = arith.constant 0 : index
    %c0_0 = arith.constant 0 : index
    %0 = vector.load %arg1[%c0, %c0_0] : memref<16x32xf32, #tpu.memory_space<vmem>>, vector<16x32xf32>
    %1 = arith.truncf %0 : vector<16x32xf32> to vector<16x32xbf16>
    %c0_1 = arith.constant 0 : index
    %c0_2 = arith.constant 0 : index
    %2 = vector.load %arg2[%c0_1, %c0_2] : memref<32x128xbf16, #tpu.memory_space<vmem>>, vector<32x128xbf16>
    %cst = arith.constant dense<0.000000e+00> : vector<16x128xf32>
    %3 = tpu.matmul %1, %2, %cst {dimension_numbers = #tpu.dot_dimension_numbers<[1], [0], [0], [1], [0, 0, 1, 1], [], []>} : vector<16x32xbf16>, vector<32x128xbf16>, vector<16x128xf32> -> vector<16x128xf32>
    %c0_3 = arith.constant 0 : index
    %c0_4 = arith.constant 0 : index
    %4 = vector.load %arg3[%c0_3, %c0_4] : memref<1x128xf32, #tpu.memory_space<vmem>>, vector<1x128xf32>
    %5 = vector.broadcast %4 : vector<1x128xf32> to vector<16x128xf32>
    %6 = arith.addf %3, %5 : vector<16x128xf32>
    %c0_5 = arith.constant 0 : index
    %c0_6 = arith.constant 0 : index
    %7 = vector.load %arg4[%c0_5, %c0_6] : memref<16x128xf32, #tpu.memory_space<vmem>>, vector<16x128xf32>
    tpu.vector_store %arg4[%c0_5, %c0_6], %6 {strides = array<i32>} : memref<16x128xf32, #tpu.memory_space<vmem>>, vector<16x128xf32>,
    return
  }
  func.func @transform_0(%arg0: i32) -> (i32, i32) {
    %c0_i32 = arith.constant 0 : i32
    %c0_i32_0 = arith.constant 0 : i32
    return %arg0, %c0_i32 : i32, i32
  }
  func.func @transform_1(%arg0: i32) -> (i32, i32) {
    %c0_i32 = arith.constant 0 : i32
    %c0_i32_0 = arith.constant 0 : i32
    %c0_i32_1 = arith.constant 0 : i32
    return %c0_i32, %c0_i32_0 : i32, i32
  }
  func.func @transform_2(%arg0: i32) -> (i32, i32) {
    %c0_i32 = arith.constant 0 : i32
    %c0_i32_0 = arith.constant 0 : i32
    %c0_i32_1 = arith.constant 0 : i32
    return %c0_i32, %c0_i32_0 : i32, i32
  }
  func.func @transform_3(%arg0: i32) -> (i32, i32) {
    %c0_i32 = arith.constant 0 : i32
    %c0_i32_0 = arith.constant 0 : i32
    return %arg0, %c0_i32 : i32, i32
  }
}

</mosaic_0001>

<bundles_post_ra>
// kernel: time_distributed_forward.1
= control target key start
LH: loop header
LB: loop body
LE: loop exit
PB: predicated region body
PF: predicated region fallthrough
CT: control target
= control target key end

     0   :  { %8 = vsyncpa [#allocation3], 0  ;;  %s234_s0 = inlined_call_operand.hbm [shape: f32[16,32], index: 0, kind: input, shape index: {}]   ;;  %s235_s1 = inlined_call_operand.hbm [shape: bf16[32,128], index: 1, kind: input, shape index: {}]   ;;  %s236_s2 = inlined_call_operand.vmem [shape: f32[1,128], index: 2, kind: input, shape index: {}]   ;;  %s237_s3 = inlined_call_operand.vmem [shape: f32[16,128], index: 3, kind: output, shape index: {}]  }
   0x1   :  { %9 = vsyncpa [#allocation5], 0  ;;  %s191_s12 = smov [#allocation2]  }
   0x2   :  { %s15_s13 = sshll.u32 %s191_s12, 4  ;;  %s16_s13 = int_to_ptr.vmem [resolvable:$true] %s15_s13 }
   0x3   :  { %s155_s14 = scalar_lea.vmem %s16_s13, 256  ;;  %p160_p1 = scmp.lt.s32.totalorder %s16_s13, %s16_s13 }
   0x4   :  { %p156_p0 = scmp.ne.s32.totalorder %s16_s13, %s155_s14  ;;  %p161_p2 = scmp.lt.s32.totalorder %s155_s14, %s155_s14 }
   0x6   :  { %p162_p3 = por %p161_p2, %p160_p1 }
   0x8   :  { %p163_p4 = pnand %p162_p3, %p156_p0 }
   0xa   :  { %166 = shalt.err (!%p163_p4)
}
   0xb   :  { %s192_s15 = smov 128   ;;  %s193_s16 = smov 8  }
   0xc   :  { %21 = dma.hbm_to_vmem [thread:$0]  %s234_s0, 256, %s16_s13, [#allocation3], %s192_s15, %s192_s15, %s193_s16  }
   0xd   :  { %s194_s19 = smov [#allocation4]  }
   0xe   :  { %s27_s20 = sshll.u32 %s194_s19, 4  ;;  %s28_s20 = int_to_ptr.vmem [resolvable:$true] %s27_s20 }
   0xf   :  { %s175_s21 = scalar_lea.vmem %s28_s20, 256  ;;  %p180_p6 = scmp.lt.s32.totalorder %s28_s20, %s28_s20 }
  0x10   :  { %p176_p5 = scmp.ne.s32.totalorder %s28_s20, %s175_s21  ;;  %p181_p7 = scmp.lt.s32.totalorder %s175_s21, %s175_s21 }
  0x12   :  { %p182_p8 = por %p181_p7, %p180_p6 }
  0x14   :  { %p183_p9 = pnand %p182_p8, %p176_p5 }
  0x16   :  { %186 = shalt.err (!%p183_p9)
}
  0x17   :  { %s195_s22 = smov 64   ;;  %s196_s23 = smov 4  }
  0x18   :  { %33 = dma.hbm_to_vmem [thread:$0]  %s235_s1, 256, %s28_s20, [#allocation5], %s195_s22, %s195_s22, %s196_s23  }
  0x19   :  { %187 = dma.done.wait [#allocation3], 256  }
  0x1a   :  { %188 = vsyncadd [#allocation3], 4294967040 }
  0x1b   :  { %189 = dma.done.wait [#allocation5], 256  }
  0x1c   :  { %190 = vsyncadd [#allocation5], 4294967040  ;;  %v197_v0 = vmov 0.0   ;;  %vm198_vm0 = vmmov 0   ;;  %v145_v1 = vld [vmem:[#allocation4 + $0x8] sm:$0xff]   ;;  %v146_v2 = vld [vmem:[#allocation4] sm:$0xff]  }
  0x1d   :  { %129 = vmatprep.subr.bf16.mxu0 %v197_v0  ;;  %133 = vmatprep.mubr.msk.bf16.mxu0 %vm198_vm0, %v197_v0  ;;  %v43_v3 = vld [vmem:[#allocation2] sm:$0xff]  ;;  %v44_v4 = vld [vmem:[#allocation2 + $0x8] sm:$0xff]  ;;  %vm69_vm1 = vcmask 261120  }
  0x1e   :  { %130 = vmatpush3.bf16.msra.mxu0 %v145_v1  ;;  %v45_v5 = vpack.c.bf16 %v44_v4, %v43_v3  ;;  %v122_v6 = vld [vmem:[%s236_s2] ss:$0 sm:$0xff] }
  0x1f   :  { %131 = vmatprep.subr.bf16.mxu0 %v197_v0 }
  0x22   :  { %132 = vmatpush3.bf16.msra.mxu0 %v146_v2 }
  0x25   :  { %134 = vmatmul.mubr.msk.bf16.vlgmr.msra.gmra.mxu0 %vm69_vm1, %v45_v5 }
  0xe5   :  { %v107_v7 = vpop.f32.mrf.mxu0 }
  0xe6   :  { %v108_v8 = vadd.f32 %v122_v6, %v107_v7 }
  0xe7   :  { %v135_v9 = vpop.f32.mrf.mxu0 }
  0xe8   :  { %114 = vst [vmem:[%s237_s3] sm:$0xff] %v108_v8 }
  0xe9   :  { %v110_v10 = vpop.f32.mrf.mxu0 }
  0xea   :  { %v111_v11 = vadd.f32 %v122_v6, %v110_v10 }
  0xeb   :  { %v136_v12 = vpop.f32.mrf.mxu0 }
  0xec   :  { %115 = vst [vmem:[%s237_s3 + $0x8] sm:$0xff] %v111_v11 }
  0xed   :  { %120 = vsyncpa [#allocation3], 1 }
  0xee   :  { %121 = vsyncpa [#allocation5], 1 }

</bundles_post_ra>
